<compile_context>
chip_gen: v7x
topology: tpu7x:2x2x1
jax: 0.10.0
libtpu: 0.0.40
codegen_flags: <defaults>
</compile_context>

<pallas_src>
import functools
import math

import jax
import jax.numpy as jnp
from jax.experimental import pallas as pl
from jax.experimental.pallas import tpu as pltpu


def _attblock_kernel(x_ref, w_ref, b_ref, out_ref, natt_ref, cla_ref, *,
                     batch_block, c_out, activation):
    # x_ref: (Bb, C_in, T); w_ref: (2*C_out, C_in); b_ref: (2*C_out, 1)
    w = w_ref[...]
    bias = b_ref[...]
    for b in range(batch_block):            # static unroll over the batch block
        x = x_ref[b]                         # (C_in, T)

        # Fused att+cla 1x1 convs: single MXU matmul, free dim = T (lane-dense).
        z = jnp.dot(w, x, preferred_element_type=jnp.float32) + bias  # (2*C_out, T)
        att = jnp.tanh(z[:c_out, :])                                  # (C_out, T)
        cla = z[c_out:, :]                                            # (C_out, T)

        # Softmax over T (lane axis) == PyTorch softmax(dim=-1) on (B, C_out, T).
        att = att - jnp.max(att, axis=-1, keepdims=True)
        e = jnp.exp(att)
        denom = jnp.sum(e, axis=-1, keepdims=True)
        norm_att = e * pl.reciprocal(denom, approx=True)

        if activation == "sigmoid":
            cla = jax.nn.sigmoid(cla)
        # activation == "linear": identity

        # Attention-weighted pooling over T.
        pooled = jnp.sum(norm_att * cla, axis=-1, keepdims=True)      # (C_out, 1)

        out_ref[b] = pooled.astype(out_ref.dtype)
        natt_ref[b] = norm_att.astype(natt_ref.dtype)
        cla_ref[b] = cla.astype(cla_ref.dtype)


def _pick_batch_block(batch, max_block=8):
    # Largest divisor of `batch` that is <= max_block (keeps the grid exact).
    for bb in range(min(batch, max_block), 0, -1):
        if batch % bb == 0:
            return bb
    return 1


def att_block_v2(x_ncw, w_att, b_att, w_cla, b_cla, activation="linear",
                 batch_block=None):
    """x_ncw: (B, C_in, T) float32, PyTorch NCW layout.

    Returns (out (B, C_out), norm_att (B, C_out, T), cla (B, C_out, T)),
    matching the PyTorch module's return convention.
    """
    B, C_in, T = x_ncw.shape
    C_out = w_att.shape[0]
    if batch_block is None:
        batch_block = _pick_batch_block(B)
    assert B % batch_block == 0
    grid = (B // batch_block,)

    # Fuse the two 1x1 convs: (2*C_out, C_in) weight, (2*C_out, 1) bias.
    w_fused = jnp.concatenate([w_att[:, :, 0], w_cla[:, :, 0]], axis=0)
    b_fused = jnp.concatenate([b_att, b_cla], axis=0).reshape(2 * C_out, 1)

    kernel = functools.partial(_attblock_kernel, batch_block=batch_block,
                               c_out=C_out, activation=activation)

    flops = 2 * B * T * C_in * (2 * C_out) + 4 * B * C_out * T
    transcendentals = B * C_out * T * (3 if activation == "sigmoid" else 2)
    bytes_accessed = 4 * (B * C_in * T + 2 * C_out * C_in + 2 * C_out
                          + B * C_out + 2 * B * C_out * T)

    out3d, norm_att, cla = pl.pallas_call(
        kernel,
        out_shape=(
            jax.ShapeDtypeStruct((B, C_out, 1), jnp.float32),
            jax.ShapeDtypeStruct((B, C_out, T), jnp.float32),
            jax.ShapeDtypeStruct((B, C_out, T), jnp.float32),
        ),
        grid_spec=pltpu.PrefetchScalarGridSpec(
            num_scalar_prefetch=0,
            grid=grid,
            in_specs=[
                pl.BlockSpec((batch_block, C_in, T), lambda i: (i, 0, 0)),
                pl.BlockSpec((2 * C_out, C_in), lambda i: (0, 0)),
                pl.BlockSpec((2 * C_out, 1), lambda i: (0, 0)),
            ],
            out_specs=[
                pl.BlockSpec((batch_block, C_out, 1), lambda i: (i, 0, 0)),
                pl.BlockSpec((batch_block, C_out, T), lambda i: (i, 0, 0)),
                pl.BlockSpec((batch_block, C_out, T), lambda i: (i, 0, 0)),
            ],
        ),
        compiler_params=pltpu.CompilerParams(
            dimension_semantics=("parallel",)),
        cost_estimate=pl.CostEstimate(
            flops=flops, transcendentals=transcendentals,
            bytes_accessed=bytes_accessed),
    )(x_ncw, w_fused, b_fused)

    out = out3d[:, :, 0]   # squeeze trailing axis — pure reshape, no transpose
    return out, norm_att, cla


def _xavier_uniform(key, shape, fan_in, fan_out, dtype=jnp.float32):
    bound = math.sqrt(6.0 / (fan_in + fan_out))
    return jax.random.uniform(key, shape, dtype=dtype, minval=-bound, maxval=bound)


def _reference(x_ncw, w_att, b_att, w_cla, b_cla, activation):
    # Plain-JAX reference mirroring the PyTorch forward.
    att = jnp.einsum("bct,oc->bot", x_ncw, w_att[:, :, 0]) + b_att[None, :, None]
    norm_att = jax.nn.softmax(jnp.tanh(att), axis=-1)
    cla = jnp.einsum("bct,oc->bot", x_ncw, w_cla[:, :, 0]) + b_cla[None, :, None]
    if activation == "sigmoid":
        cla = jax.nn.sigmoid(cla)
    out = jnp.sum(norm_att * cla, axis=2)
    return out, norm_att, cla


if __name__ == "__main__":
    B, C_in, C_out, T = 2, 32, 8, 16
    activation = "sigmoid"

    key = jax.random.PRNGKey(0)
    kx, ka, kc = jax.random.split(key, 3)

    x = jax.random.normal(kx, (B, C_in, T), dtype=jnp.float32)

    # Conv1d weights: (out_features, in_features, kernel_size=1); xavier_uniform init.
    w_att = _xavier_uniform(ka, (C_out, C_in, 1), fan_in=C_in, fan_out=C_out)
    b_att = jnp.zeros((C_out,), dtype=jnp.float32)
    w_cla = _xavier_uniform(kc, (C_out, C_in, 1), fan_in=C_in, fan_out=C_out)
    b_cla = jnp.zeros((C_out,), dtype=jnp.float32)

    out, norm_att, cla = att_block_v2(x, w_att, b_att, w_cla, b_cla, activation)
    jax.block_until_ready((out, norm_att, cla))

    # Sanity check against plain-JAX reference of the PyTorch forward.
    ref_out, ref_natt, ref_cla = _reference(x, w_att, b_att, w_cla, b_cla, activation)
    assert out.shape == (B, C_out)
    assert norm_att.shape == (B, C_out, T)
    assert cla.shape == (B, C_out, T)
    # norm_att / out tolerance loosened for the approx reciprocal (EUP vrcp).
    assert jnp.allclose(out, ref_out, atol=2e-3)
    assert jnp.allclose(norm_att, ref_natt, atol=2e-3)
    assert jnp.allclose(cla, ref_cla, atol=1e-5)

    print("KERNEL_OK")
</pallas_src>

<mosaic_0001>
module attributes {stable_mosaic.version = 11 : i64} {
  func.func @_attblock_kernel(%arg0: i32, %arg1: memref<2x32x16xf32, #tpu.memory_space<vmem>>, %arg2: memref<16x32xf32, #tpu.memory_space<vmem>>, %arg3: memref<16x1xf32, #tpu.memory_space<vmem>>, %arg4: memref<2x8x1xf32, #tpu.memory_space<vmem>>, %arg5: memref<2x8x16xf32, #tpu.memory_space<vmem>>, %arg6: memref<2x8x16xf32, #tpu.memory_space<vmem>>) attributes {dimension_semantics = [#tpu.dimension_semantics<parallel>], iteration_bounds = array<i64: 1>, scalar_prefetch = 0 : i64, scratch_operands = 0 : i64, tpu.core_type = #tpu.core_type<tc>, window_params = [{transform_indices = @transform_0, window_bounds = array<i64: 2, 32, 16>}, {pipeline_mode = #tpu.pipeline_mode<synchronous>, transform_indices = @transform_1, window_bounds = array<i64: 16, 32>}, {pipeline_mode = #tpu.pipeline_mode<synchronous>, transform_indices = @transform_2, window_bounds = array<i64: 16, 1>}, {transform_indices = @transform_3, window_bounds = array<i64: 2, 8, 1>}, {transform_indices = @transform_4, window_bounds = array<i64: 2, 8, 16>}, {transform_indices = @transform_5, window_bounds = array<i64: 2, 8, 16>}]} {
    %c0 = arith.constant 0 : index
    %c0_0 = arith.constant 0 : index
    %0 = vector.load %arg2[%c0, %c0_0] : memref<16x32xf32, #tpu.memory_space<vmem>>, vector<16x32xf32>
    %c0_1 = arith.constant 0 : index
    %c0_2 = arith.constant 0 : index
    %1 = vector.load %arg3[%c0_1, %c0_2] : memref<16x1xf32, #tpu.memory_space<vmem>>, vector<16x1xf32>
    %c0_3 = arith.constant 0 : index
    %c0_4 = arith.constant 0 : index
    %c0_5 = arith.constant 0 : index
    %2 = vector.load %arg1[%c0_3, %c0_4, %c0_5] : memref<2x32x16xf32, #tpu.memory_space<vmem>>, vector<1x32x16xf32>
    %3 = vector.shape_cast %2 : vector<1x32x16xf32> to vector<32x16xf32>
    %cst = arith.constant dense<0.000000e+00> : vector<16x16xf32>
    %4 = tpu.matmul %0, %3, %cst {dimension_numbers = #tpu.dot_dimension_numbers<[1], [0], [0], [1], [0, 0, 1, 1], [], []>} : vector<16x32xf32>, vector<32x16xf32>, vector<16x16xf32> -> vector<16x16xf32>
    %5 = vector.broadcast %1 : vector<16x1xf32> to vector<16x16xf32>
    %6 = arith.addf %4, %5 : vector<16x16xf32>
    %7 = vector.extract_strided_slice %6 {offsets = [0, 0], sizes = [8, 16], strides = [1, 1]} : vector<16x16xf32> to vector<8x16xf32>
    %8 = math.tanh %7 : vector<8x16xf32>
    %9 = vector.extract_strided_slice %6 {offsets = [8, 0], sizes = [8, 16], strides = [1, 1]} : vector<16x16xf32> to vector<8x16xf32>
    %cst_6 = arith.constant dense<0xFF800000> : vector<8xf32>
    %10 = vector.multi_reduction <maximumf>, %8, %cst_6 [1] : vector<8x16xf32> to vector<8xf32>
    %11 = vector.shape_cast %10 : vector<8xf32> to vector<8x1xf32>
    %12 = vector.broadcast %11 : vector<8x1xf32> to vector<8x16xf32>
    %13 = arith.subf %8, %12 : vector<8x16xf32>
    %14 = math.exp %13 : vector<8x16xf32>
    %cst_7 = arith.constant dense<0.000000e+00> : vector<8xf32>
    %15 = vector.multi_reduction <add>, %14, %cst_7 [1] : vector<8x16xf32> to vector<8xf32>
    %16 = vector.shape_cast %15 : vector<8xf32> to vector<8x1xf32>
    %17 = tpu.reciprocal %16 {approx = true} : vector<8x1xf32> -> vector<8x1xf32>
    %18 = vector.broadcast %17 : vector<8x1xf32> to vector<8x16xf32>
    %19 = arith.mulf %14, %18 : vector<8x16xf32>
    %20 = arith.negf %9 : vector<8x16xf32>
    %21 = math.exp %20 : vector<8x16xf32>
    %cst_8 = arith.constant 1.000000e+00 : f32
    %22 = vector.broadcast %cst_8 : f32 to vector<8x16xf32>
    %23 = arith.addf %22, %21 : vector<8x16xf32>
    %24 = arith.divf %22, %23 : vector<8x16xf32>
    %25 = arith.mulf %19, %24 : vector<8x16xf32>
    %cst_9 = arith.constant dense<0.000000e+00> : vector<8xf32>
    %26 = vector.multi_reduction <add>, %25, %cst_9 [1] : vector<8x16xf32> to vector<8xf32>
    %27 = vector.shape_cast %26 : vector<8xf32> to vector<8x1xf32>
    %c0_10 = arith.constant 0 : index
    %c0_11 = arith.constant 0 : index
    %c0_12 = arith.constant 0 : index
    %28 = vector.load %arg4[%c0_10, %c0_11, %c0_12] : memref<2x8x1xf32, #tpu.memory_space<vmem>>, vector<1x8x1xf32>
    %29 = vector.shape_cast %28 : vector<1x8x1xf32> to vector<8x1xf32>
    %30 = vector.shape_cast %27 : vector<8x1xf32> to vector<1x8x1xf32>
    tpu.vector_store %arg4[%c0_10, %c0_11, %c0_12], %30 {strides = array<i32>} : memref<2x8x1xf32, #tpu.memory_space<vmem>>, vector<1x8x1xf32>,
    %c0_13 = arith.constant 0 : index
    %c0_14 = arith.constant 0 : index
    %c0_15 = arith.constant 0 : index
    %31 = vector.load %arg5[%c0_13, %c0_14, %c0_15] : memref<2x8x16xf32, #tpu.memory_space<vmem>>, vector<1x8x16xf32>
    %32 = vector.shape_cast %31 : vector<1x8x16xf32> to vector<8x16xf32>
    %33 = vector.shape_cast %19 : vector<8x16xf32> to vector<1x8x16xf32>
    tpu.vector_store %arg5[%c0_13, %c0_14, %c0_15], %33 {strides = array<i32>} : memref<2x8x16xf32, #tpu.memory_space<vmem>>, vector<1x8x16xf32>,
    %c0_16 = arith.constant 0 : index
    %c0_17 = arith.constant 0 : index
    %c0_18 = arith.constant 0 : index
    %34 = vector.load %arg6[%c0_16, %c0_17, %c0_18] : memref<2x8x16xf32, #tpu.memory_space<vmem>>, vector<1x8x16xf32>
    %35 = vector.shape_cast %34 : vector<1x8x16xf32> to vector<8x16xf32>
    %36 = vector.shape_cast %24 : vector<8x16xf32> to vector<1x8x16xf32>
    tpu.vector_store %arg6[%c0_16, %c0_17, %c0_18], %36 {strides = array<i32>} : memref<2x8x16xf32, #tpu.memory_space<vmem>>, vector<1x8x16xf32>,
    %c1 = arith.constant 1 : index
    %c0_19 = arith.constant 0 : index
    %c0_20 = arith.constant 0 : index
    %37 = vector.load %arg1[%c1, %c0_19, %c0_20] : memref<2x32x16xf32, #tpu.memory_space<vmem>>, vector<1x32x16xf32>
    %38 = vector.shape_cast %37 : vector<1x32x16xf32> to vector<32x16xf32>
    %cst_21 = arith.constant dense<0.000000e+00> : vector<16x16xf32>
    %39 = tpu.matmul %0, %38, %cst_21 {dimension_numbers = #tpu.dot_dimension_numbers<[1], [0], [0], [1], [0, 0, 1, 1], [], []>} : vector<16x32xf32>, vector<32x16xf32>, vector<16x16xf32> -> vector<16x16xf32>
    %40 = vector.broadcast %1 : vector<16x1xf32> to vector<16x16xf32>
    %41 = arith.addf %39, %40 : vector<16x16xf32>
    %42 = vector.extract_strided_slice %41 {offsets = [0, 0], sizes = [8, 16], strides = [1, 1]} : vector<16x16xf32> to vector<8x16xf32>
    %43 = math.tanh %42 : vector<8x16xf32>
    %44 = vector.extract_strided_slice %41 {offsets = [8, 0], sizes = [8, 16], strides = [1, 1]} : vector<16x16xf32> to vector<8x16xf32>
    %cst_22 = arith.constant dense<0xFF800000> : vector<8xf32>
    %45 = vector.multi_reduction <maximumf>, %43, %cst_22 [1] : vector<8x16xf32> to vector<8xf32>
    %46 = vector.shape_cast %45 : vector<8xf32> to vector<8x1xf32>
    %47 = vector.broadcast %46 : vector<8x1xf32> to vector<8x16xf32>
    %48 = arith.subf %43, %47 : vector<8x16xf32>
    %49 = math.exp %48 : vector<8x16xf32>
    %cst_23 = arith.constant dense<0.000000e+00> : vector<8xf32>
    %50 = vector.multi_reduction <add>, %49, %cst_23 [1] : vector<8x16xf32> to vector<8xf32>
    %51 = vector.shape_cast %50 : vector<8xf32> to vector<8x1xf32>
    %52 = tpu.reciprocal %51 {approx = true} : vector<8x1xf32> -> vector<8x1xf32>
    %53 = vector.broadcast %52 : vector<8x1xf32> to vector<8x16xf32>
    %54 = arith.mulf %49, %53 : vector<8x16xf32>
    %55 = arith.negf %44 : vector<8x16xf32>
    %56 = math.exp %55 : vector<8x16xf32>
    %cst_24 = arith.constant 1.000000e+00 : f32
    %57 = vector.broadcast %cst_24 : f32 to vector<8x16xf32>
    %58 = arith.addf %57, %56 : vector<8x16xf32>
    %59 = arith.divf %57, %58 : vector<8x16xf32>
    %60 = arith.mulf %54, %59 : vector<8x16xf32>
    %cst_25 = arith.constant dense<0.000000e+00> : vector<8xf32>
    %61 = vector.multi_reduction <add>, %60, %cst_25 [1] : vector<8x16xf32> to vector<8xf32>
    %62 = vector.shape_cast %61 : vector<8xf32> to vector<8x1xf32>
    %c1_26 = arith.constant 1 : index
    %c0_27 = arith.constant 0 : index
    %c0_28 = arith.constant 0 : index
    %63 = vector.load %arg4[%c1_26, %c0_27, %c0_28] : memref<2x8x1xf32, #tpu.memory_space<vmem>>, vector<1x8x1xf32>
    %64 = vector.shape_cast %63 : vector<1x8x1xf32> to vector<8x1xf32>
    %65 = vector.shape_cast %62 : vector<8x1xf32> to vector<1x8x1xf32>
    tpu.vector_store %arg4[%c1_26, %c0_27, %c0_28], %65 {strides = array<i32>} : memref<2x8x1xf32, #tpu.memory_space<vmem>>, vector<1x8x1xf32>,
    %c1_29 = arith.constant 1 : index
    %c0_30 = arith.constant 0 : index
    %c0_31 = arith.constant 0 : index
    %66 = vector.load %arg5[%c1_29, %c0_30, %c0_31] : memref<2x8x16xf32, #tpu.memory_space<vmem>>, vector<1x8x16xf32>
    %67 = vector.shape_cast %66 : vector<1x8x16xf32> to vector<8x16xf32>
    %68 = vector.shape_cast %54 : vector<8x16xf32> to vector<1x8x16xf32>
    tpu.vector_store %arg5[%c1_29, %c0_30, %c0_31], %68 {strides = array<i32>} : memref<2x8x16xf32, #tpu.memory_space<vmem>>, vector<1x8x16xf32>,
    %c1_32 = arith.constant 1 : index
    %c0_33 = arith.constant 0 : index
    %c0_34 = arith.constant 0 : index
    %69 = vector.load %arg6[%c1_32, %c0_33, %c0_34] : memref<2x8x16xf32, #tpu.memory_space<vmem>>, vector<1x8x16xf32>
    %70 = vector.shape_cast %69 : vector<1x8x16xf32> to vector<8x16xf32>
    %71 = vector.shape_cast %59 : vector<8x16xf32> to vector<1x8x16xf32>
    tpu.vector_store %arg6[%c1_32, %c0_33, %c0_34], %71 {strides = array<i32>} : memref<2x8x16xf32, #tpu.memory_space<vmem>>, vector<1x8x16xf32>,
    return
  }
  func.func @transform_0(%arg0: i32) -> (i32, i32, i32) {
    %c0_i32 = arith.constant 0 : i32
    %c0_i32_0 = arith.constant 0 : i32
    %c0_i32_1 = arith.constant 0 : i32
    return %arg0, %c0_i32, %c0_i32_0 : i32, i32, i32
  }
  func.func @transform_1(%arg0: i32) -> (i32, i32) {
    %c0_i32 = arith.constant 0 : i32
    %c0_i32_0 = arith.constant 0 : i32
    %c0_i32_1 = arith.constant 0 : i32
    return %c0_i32, %c0_i32_0 : i32, i32
  }
  func.func @transform_2(%arg0: i32) -> (i32, i32) {
    %c0_i32 = arith.constant 0 : i32
    %c0_i32_0 = arith.constant 0 : i32
    %c0_i32_1 = arith.constant 0 : i32
    return %c0_i32, %c0_i32_0 : i32, i32
  }
  func.func @transform_3(%arg0: i32) -> (i32, i32, i32) {
    %c0_i32 = arith.constant 0 : i32
    %c0_i32_0 = arith.constant 0 : i32
    %c0_i32_1 = arith.constant 0 : i32
    return %arg0, %c0_i32, %c0_i32_0 : i32, i32, i32
  }
  func.func @transform_4(%arg0: i32) -> (i32, i32, i32) {
    %c0_i32 = arith.constant 0 : i32
    %c0_i32_0 = arith.constant 0 : i32
    %c0_i32_1 = arith.constant 0 : i32
    return %arg0, %c0_i32, %c0_i32_0 : i32, i32, i32
  }
  func.func @transform_5(%arg0: i32) -> (i32, i32, i32) {
    %c0_i32 = arith.constant 0 : i32
    %c0_i32_0 = arith.constant 0 : i32
    %c0_i32_1 = arith.constant 0 : i32
    return %arg0, %c0_i32, %c0_i32_0 : i32, i32, i32
  }
}

</mosaic_0001>

<bundles_post_ra>
// kernel: tpu_custom_call.1
= control target key start
LH: loop header
LB: loop body
LE: loop exit
PB: predicated region body
PF: predicated region fallthrough
CT: control target
= control target key end

     0   :  { %11 = vsyncpa [#allocation3], 0  ;;  %vm37_vm0 = vcmask 261120   ;;  %v426_v7 = vmov 0   ;;  %s541_s0 = inlined_call_operand.vmem [shape: f32[2,32,16], index: 0, kind: input, shape index: {}]   ;;  %s542_s1 = inlined_call_operand.vmem [shape: f32[16,32], index: 1, kind: input, shape index: {}]   ;;  %s543_s2 = inlined_call_operand.vmem [shape: f32[16,1], index: 2, kind: input, shape index: {}]   ;;  %s544_s3 = inlined_call_operand.vmem [shape: f32[2,8,1], index: 3, kind: output, shape index: {0}]   ;;  %s545_s4 = inlined_call_operand.hbm [shape: f32[2,8,16], index: 4, kind: output, shape index: {1}]   ;;  %s546_s5 = inlined_call_operand.hbm [shape: f32[2,8,16], index: 5, kind: output, shape index: {2}]  }
   0x1   :  { %v23_v0 = vld [vmem:[%s541_s0] sm:$0xff]  ;;  %v24_v1 = vld [vmem:[%s541_s0 + $0x8] sm:$0xff]  ;;  %v25_v5 = vld [vmem:[%s541_s0 + $0x10] sm:$0xff]  ;;  %356 = vset.pattern.permute.xlu0 %v426_v7  ;;  %357 = vset.pattern.permute.xlu1 %v426_v7 }
   0x2   :  { %v293_v2 = vld [vmem:[%s541_s0 + $0x20] sm:$0xff]  ;;  %v335_v3 = vpack.c.bf16 %v24_v1, %v23_v0  ;;  %v294_v4 = vld [vmem:[%s541_s0 + $0x28] sm:$0xff]  ;;  %v26_v6 = vld [vmem:[%s541_s0 + $0x18] sm:$0xff] }
   0x3   :  { %v343_v8 = vpack.c.bf16 %v294_v4, %v293_v2  ;;  %v339_v9 = vpack.c.bf16 %v26_v6, %v25_v5  ;;  %v295_v10 = vld [vmem:[%s541_s0 + $0x30] sm:$0xff]  ;;  %v296_v11 = vld [vmem:[%s541_s0 + $0x38] sm:$0xff]  ;;  %v19_v12 = vld [vmem:[%s542_s1] sm:$0xff] }
   0x4   :  { %336 = vmatprep.subr.bf16.mxu0 %v335_v3  ;;  %v347_v13 = vpack.c.bf16 %v296_v11, %v295_v10  ;;  %321 = vmatprep.mubr.msk.f32.mxu0 %vm37_vm0, %v19_v12 }
   0x5   :  { %12 = vsyncpa [#allocation5], 0  ;;  %344 = vmatprep.subr.bf16.mxu1 %v343_v8  ;;  %338 = vmatpush3.bf16.msra.mxu0 %v335_v3  ;;  %v21_v14 = vld [vmem:[%s543_s2] sm:$0xff]  ;;  %v20_v15 = vld [vmem:[%s542_s1 + $0x8] sm:$0xff]  ;;  %vm120_vm1 = vcmask 130048  }
   0x6   :  { %346 = vmatpush3.bf16.msra.mxu1 %v343_v8  ;;  %340 = vmatprep.subr.bf16.mxu0 %v339_v9  ;;  %v22_v27 = vld [vmem:[%s543_s2 + $0x8] sm:$0xff]  ;;  %s427_s2 = smov [#allocation2]  }
   0x7   :  { %348 = vmatprep.subr.bf16.mxu1 %v347_v13  ;;  %332 = vmatprep.mubr.msk.f32.mxu1 %vm37_vm0, %v19_v12  ;;  %s261_s15 = sshll.u32 %s427_s2, 4  ;;  %s262_s15 = int_to_ptr.vmem [resolvable:$true] %s261_s15 }
   0x8   :  { %29 = vperm.xlu0 %356, %v21_v14   ;;  %s378_s16 = scalar_lea.vmem %s262_s15, 256  ;;  %p383_p1 = scmp.lt.s32.totalorder %s262_s15, %s262_s15 }
   0x9   :  { %342 = vmatpush3.bf16.msra.mxu0 %v339_v9  ;;  %p379_p0 = scmp.ne.s32.totalorder %s262_s15, %s378_s16  ;;  %p384_p2 = scmp.lt.s32.totalorder %s378_s16, %s378_s16 }
   0xa   :  { %350 = vmatpush3.bf16.msra.mxu1 %v347_v13 }
   0xb   :  { %p385_p3 = por %p384_p2, %p383_p1 }
   0xc   :  { %322 = vmatmul.mubr.msk.f32.vlgmr.msra.gmra.mrb[0].mxu0 %vm37_vm0, %v20_v15 }
   0xd   :  { %333 = vmatmul.mubr.msk.f32.vlgmr.msra.gmra.mrb[0].mxu1 %vm37_vm0, %v20_v15  ;;  %p386_p4 = pnand %p385_p3, %p379_p0 }
  0x87   :  { %v30_v16 = vpop.permute.xlu0 %29 }
  0xdf   :  { %v323_v17 = vpop.f32.mrb[0].mxu0 }
  0xe0   :  { %v334_v18 = vpop.f32.mrb[0].mxu1  ;;  %v110_v19 = vpop.f32.mrb[1].mxu0 }
  0xe1   :  { %v111_v20 = vadd.f32 %v110_v19, %v30_v16  ;;  %v217_v21 = vpop.f32.mrb[1].mxu1 }
  0xe2   :  { %v218_v22 = vadd.f32 %v217_v21, %v30_v16 }
  0xe3   :  { %358 = vtanh.f32 %v111_v20 }
  0xe4   :  { %360 = vtanh.f32 %v218_v22 }
  0xed   :  { %v359_v23 = vpop.eup %358 }
  0xee   :  { %v361_v24 = vpop.eup %360  ;;  %v121_v25 = vsel %vm120_vm1, %v359_v23, -inf }
  0xef   :  { %v227_v26 = vsel %vm120_vm1, %v361_v24, -inf  ;;  %122 = vmax.xlane.f32.xlu0 %v121_v25 }
  0xf0   :  { %228 = vmax.xlane.f32.xlu1 %v227_v26 }
 0x101   :  { %34 = vperm.xlu1 %357, %v22_v27  }
 0x17c   :  { %v123_v28 = vpop.xlane.xlu0 %122 }
 0x17d   :  { %v229_v29 = vpop.xlane.xlu1 %228  ;;  %v124_v30 = vsub.f32 %v359_v23, %v123_v28 }
 0x17e   :  { %v230_v31 = vsub.f32 %v361_v24, %v229_v29 }
 0x17f   :  { %v125_v32 = vmul.f32 1.442695, %v124_v30 }
 0x180   :  { %v231_v33 = vmul.f32 1.442695, %v230_v31 }
 0x181   :  { %362 = vpow2.f32 %v125_v32  ;;  %v35_v34 = vpop.permute.xlu1 %34 }
 0x182   :  { %364 = vpow2.f32 %v231_v33  ;;  %v116_v35 = vadd.f32 %v323_v17, %v35_v34  ;;  %v223_v36 = vadd.f32 %v334_v18, %v35_v34 }
 0x184   :  { %v292_v37 = vmul.f32 -1.442695, %v116_v35  ;;  %v299_v38 = vmul.f32 -1.442695, %v223_v36 }
 0x186   :  { %366 = vpow2.f32 %v292_v37 }
 0x187   :  { %368 = vpow2.f32 %v299_v38 }
 0x18b   :  { %v363_v39 = vpop.eup %362 }
 0x18c   :  { %v365_v40 = vpop.eup %364  ;;  %v127_v41 = vsel %vm120_vm1, %v363_v39, 0.0 }
 0x18d   :  { %v233_v42 = vsel %vm120_vm1, %v365_v40, 0.0  ;;  %128 = vadd.xlane.f32.xlu1 %v127_v41 }
 0x18e   :  { %234 = vadd.xlane.f32.xlu0 %v233_v42 }
 0x190   :  { %v367_v43 = vpop.eup %366 }
 0x191   :  { %v369_v44 = vpop.eup %368  ;;  %v135_v45 = vadd.f32 1.0, %v367_v43 }
 0x192   :  { %v241_v46 = vadd.f32 1.0, %v369_v44 }
 0x193   :  { %370 = vrcp.f32 %v135_v45 }
 0x194   :  { %372 = vrcp.f32 %v241_v46 }
 0x19d   :  { %v371_v47 = vpop.eup %370 }
 0x19e   :  { %v373_v48 = vpop.eup %372  ;;  %145 = vst.msk [vmem:[#allocation4] sm:$0xff] %vm120_vm1, %v371_v47 }
 0x19f   :  { %253 = vst.msk [vmem:[#allocation4 + $0x8] sm:$0xff] %vm120_vm1, %v373_v48 }
 0x21a   :  { %v129_v49 = vpop.xlane.xlu1 %128 }
 0x21b   :  { %374 = vrcp.f32 %v129_v49  ;;  %v235_v50 = vpop.xlane.xlu0 %234 }
 0x21c   :  { %376 = vrcp.f32 %v235_v50 }
 0x225   :  { %v375_v51 = vpop.eup %374 }
 0x226   :  { %v377_v52 = vpop.eup %376  ;;  %v131_v53 = vmul.f32 %v375_v51, %v363_v39 }
 0x227   :  { %v237_v54 = vmul.f32 %v377_v52, %v365_v40 }
 0x228   :  { %v138_v55 = vmul.f32 %v371_v47, %v131_v53  ;;  %144 = vst.msk [vmem:[#allocation2] sm:$0xff] %vm120_vm1, %v131_v53 }
 0x229   :  { %251 = vst.msk [vmem:[#allocation2 + $0x8] sm:$0xff] %vm120_vm1, %v237_v54  ;;  %v244_v57 = vmul.f32 %v373_v48, %v237_v54 }
 0x22a   :  { %v139_v56 = vsel %vm120_vm1, %v138_v55, 0.0 }
 0x22b   :  { %140 = vadd.xlane.f32.xlu0 %v139_v56  ;;  %v245_v58 = vsel %vm120_vm1, %v244_v57, 0.0 }
 0x22f   :  { %246 = vadd.xlane.f32.xlu0 %v245_v58 }
 0x230   :  { %389 = shalt.err (!%p386_p4)
}
 0x231   :  { %s390_s19 = scalar_lea.hbm %s545_s4, 256 }
 0x232   :  { %p391_p5 = scmp.ne.s32.totalorder %s545_s4, %s390_s19  ;;  %p394_p6 = scmp.lt.u32.totalorder %s390_s19, %s545_s4 }
 0x234   :  { %p396_p7 = pnand %p394_p6, %p391_p5 }
 0x236   :  { %399 = shalt.err (!%p396_p7)
}
 0x237   :  { %s428_s24 = smov 128   ;;  %s429_s25 = smov 8  }
 0x238   :  { %267 = dma.vmem_to_hbm [thread:$0]  %s262_s15, 256, %s545_s4, [#allocation3], %s428_s24, %s428_s24, %s429_s25  }
 0x239   :  { %s430_s28 = smov [#allocation4]  }
 0x23a   :  { %s273_s29 = sshll.u32 %s430_s28, 4  ;;  %s274_s29 = int_to_ptr.vmem [resolvable:$true] %s273_s29 }
 0x23b   :  { %s400_s30 = scalar_lea.vmem %s274_s29, 256  ;;  %p405_p9 = scmp.lt.s32.totalorder %s274_s29, %s274_s29 }
 0x23c   :  { %p401_p8 = scmp.ne.s32.totalorder %s274_s29, %s400_s30  ;;  %p406_p10 = scmp.lt.s32.totalorder %s400_s30, %s400_s30 }
 0x23e   :  { %p407_p11 = por %p406_p10, %p405_p9 }
 0x240   :  { %p408_p12 = pnand %p407_p11, %p401_p8 }
 0x242   :  { %411 = shalt.err (!%p408_p12)
}
 0x243   :  { %s412_s8 = scalar_lea.hbm %s546_s5, 256 }
 0x244   :  { %p413_p13 = scmp.ne.s32.totalorder %s546_s5, %s412_s8  ;;  %p416_p0 = scmp.lt.u32.totalorder %s412_s8, %s546_s5 }
 0x246   :  { %p418_p1 = pnand %p416_p0, %p413_p13 }
 0x248   :  { %421 = shalt.err (!%p418_p1)
}
 0x249   :  { %279 = dma.vmem_to_hbm [thread:$0]  %s274_s29, 256, %s546_s5, [#allocation5], %s428_s24, %s428_s24, %s429_s25   ;;  %vm142_vm2 = vcmask 7168  }
 0x2b8   :  { %v141_v59 = vpop.xlane.xlu0 %140 }
 0x2b9   :  { %143 = vst.msk [vmem:[%s544_s3] sm:$0xff] %vm142_vm2, %v141_v59 }
 0x2bc   :  { %v247_v60 = vpop.xlane.xlu0 %246 }
 0x2bd   :  { %300 = vst.msk [vmem:[%s544_s3 + $0x8] sm:$0xff] %vm142_vm2, %v247_v60 }
 0x2be   :  { %422 = dma.done.wait [#allocation3], 256  }
 0x2bf   :  { %423 = vsyncadd [#allocation3], 4294967040 }
 0x2c0   :  { %424 = dma.done.wait [#allocation5], 256  }
 0x2c1   :  { %425 = vsyncadd [#allocation5], 4294967040 }
 0x2c2   :  { %288 = vsyncpa [#allocation3], 1 }
 0x2c3   :  { %289 = vsyncpa [#allocation5], 1 }

</bundles_post_ra>
